<compile_context>
chip_gen: v7x
topology: tpu7x:2x2x1
jax: 0.10.0
libtpu: 0.0.40
codegen_flags: <defaults>
</compile_context>

<pallas_src>
import functools

import jax
import jax.numpy as jnp
import numpy as np
from jax.experimental import pallas as pl
from jax.experimental.pallas import tpu as pltpu


# ----------------------------- fused LayerNormProxy kernel -----------------------------
def _layernorm_proxy_kernel(x_ref, g_ref, b_ref, o_ref, *, eps, c):
    # x_ref : (rows, blk_hw)  rows = whole channel-groups (multiple of C)
    # g_ref : (rows, 1)       gamma, tiled across the groups inside a block
    # b_ref : (rows, 1)       beta,  tiled across the groups inside a block
    # o_ref : (rows, blk_hw)
    x = x_ref[...].astype(jnp.float32)
    rows = x.shape[0]
    parts = []
    for s in range(0, rows, c):                             # static unrolled loop over groups
        xg = x[s:s + c, :]                                   # static sublane slice
        mean = jnp.mean(xg, axis=0, keepdims=True)           # reduce over channels
        xc = xg - mean
        var = jnp.mean(xc * xc, axis=0, keepdims=True)       # biased variance (PyTorch LN)
        parts.append(xc * jax.lax.rsqrt(var + eps))          # EUP rsqrt
    y = parts[0] if len(parts) == 1 else jnp.concatenate(parts, axis=0)
    y = y * g_ref[...].astype(jnp.float32) + b_ref[...].astype(jnp.float32)
    o_ref[...] = y.astype(o_ref.dtype)


def _pick_blocks(num_rows, hw, c, itemsize, budget_bytes=1 << 20):
    """Choose (rows_per_block, hw_per_block) for the (B*C, H*W) layout.

    rows_per_block is a whole number of channel groups, preferring multiples of
    the sublane packing (8 for f32, 16 for bf16); hw_per_block targets ~1 MiB
    of input per grid step and is split into lane-dense (x128) chunks only if
    that budget would be exceeded.
    """
    sub = max(8, 32 // max(1, itemsize))       # sublane packing of the dtype
    b = num_rows // c

    valid = [g for g in range(1, b + 1) if b % g == 0 and (g * c) % sub == 0]
    if valid:
        fitting = [g for g in valid if g * c * hw * itemsize <= budget_bytes]
        rows = (max(fitting) if fitting else min(valid)) * c
    else:
        rows = num_rows                        # full row extent is always a legal block

    if rows * hw * itemsize <= budget_bytes or hw % 128 != 0:
        blk_hw = hw                            # full extent (always legal)
    else:
        lane_cap = max(128, (budget_bytes // (rows * itemsize)) // 128 * 128)
        blk_hw = 128
        d = 128
        while d <= min(hw, lane_cap):
            if hw % d == 0:
                blk_hw = d
            d += 128
    return rows, blk_hw


def layernorm_proxy_flat(x2, gamma, beta, *, num_channels, eps=1e-5):
    """LayerNorm over channel groups on the flat (B*C, H*W) layout."""
    R, HW = x2.shape
    C = int(num_channels)
    assert R % C == 0, "rows must be batch * channels"

    rows, blk_hw = _pick_blocks(R, HW, C, x2.dtype.itemsize)
    groups_per_block = rows // C

    g2 = jnp.tile(jnp.reshape(gamma, (C, 1)), (groups_per_block, 1))
    b2 = jnp.tile(jnp.reshape(beta, (C, 1)), (groups_per_block, 1))

    grid = (R // rows, HW // blk_hw)
    return pl.pallas_call(
        functools.partial(_layernorm_proxy_kernel, eps=float(eps), c=C),
        out_shape=jax.ShapeDtypeStruct((R, HW), x2.dtype),
        grid_spec=pltpu.PrefetchScalarGridSpec(
            num_scalar_prefetch=0,
            grid=grid,
            in_specs=[
                pl.BlockSpec((rows, blk_hw), lambda i, j: (i, j)),
                pl.BlockSpec((rows, 1), lambda i, j: (0, 0)),
                pl.BlockSpec((rows, 1), lambda i, j: (0, 0)),
            ],
            out_specs=pl.BlockSpec((rows, blk_hw), lambda i, j: (i, j)),
        ),
        compiler_params=pltpu.CompilerParams(
            dimension_semantics=("parallel", "parallel")),
    )(x2, g2, b2)


def layernorm_proxy(x, gamma, beta, *, eps=1e-5):
    """x: (B, C, H, W) NCHW.  Returns LayerNorm over the channel dim, NCHW."""
    B, C, H, W = x.shape
    # NOTE: the reshape to/from (B*C, H*W) can lower to an XLA relayout copy
    # when W % 128 != 0; prefer calling `layernorm_proxy_flat` directly if the
    # surrounding ops can stay in the flat layout.
    x2 = x.reshape(B * C, H * W)
    out2 = layernorm_proxy_flat(x2, gamma, beta, num_channels=C, eps=eps)
    return out2.reshape(B, C, H, W)


# ----------------------------- pure-JAX reference -----------------------------
def layernorm_proxy_reference(x, gamma, beta, eps=1e-5):
    # b c h w -> b h w c ; LayerNorm(C) ; b h w c -> b c h w
    xt = jnp.transpose(x, (0, 2, 3, 1)).astype(jnp.float32)
    mean = jnp.mean(xt, axis=-1, keepdims=True)
    var = jnp.mean((xt - mean) ** 2, axis=-1, keepdims=True)
    y = (xt - mean) / jnp.sqrt(var + eps) * gamma + beta
    return jnp.transpose(y, (0, 3, 1, 2)).astype(x.dtype)


if __name__ == "__main__":
    # Shapes implied by the module: x is NCHW (b, c, h, w)
    B, C, H, W = 2, 4, 16, 16

    key = jax.random.PRNGKey(0)
    kx, kg, kb = jax.random.split(key, 3)

    x = jax.random.normal(kx, (B, C, H, W), dtype=jnp.float32)
    # nn.LayerNorm init is weight=1, bias=0; perturb so the affine path is tested.
    gamma = 1.0 + 0.1 * jax.random.normal(kg, (C,), dtype=jnp.float32)
    beta = 0.1 * jax.random.normal(kb, (C,), dtype=jnp.float32)

    out = layernorm_proxy(x, gamma, beta)
    out = jax.block_until_ready(out)

    ref = layernorm_proxy_reference(x, gamma, beta)
    np.testing.assert_allclose(np.asarray(out), np.asarray(ref), rtol=1e-4, atol=1e-4)

    print("KERNEL_OK")
</pallas_src>

<mosaic_0001>
module attributes {stable_mosaic.version = 11 : i64} {
  func.func @_layernorm_proxy_kernel(%arg0: i32, %arg1: i32, %arg2: memref<8x256xf32, #tpu.memory_space<vmem>>, %arg3: memref<8x1xf32, #tpu.memory_space<vmem>>, %arg4: memref<8x1xf32, #tpu.memory_space<vmem>>, %arg5: memref<8x256xf32, #tpu.memory_space<vmem>>) attributes {dimension_semantics = [#tpu.dimension_semantics<parallel>, #tpu.dimension_semantics<parallel>], iteration_bounds = array<i64: 1, 1>, scalar_prefetch = 0 : i64, scratch_operands = 0 : i64, tpu.core_type = #tpu.core_type<tc>, window_params = [{transform_indices = @transform_0, window_bounds = array<i64: 8, 256>}, {pipeline_mode = #tpu.pipeline_mode<synchronous>, transform_indices = @transform_1, window_bounds = array<i64: 8, 1>}, {pipeline_mode = #tpu.pipeline_mode<synchronous>, transform_indices = @transform_2, window_bounds = array<i64: 8, 1>}, {transform_indices = @transform_3, window_bounds = array<i64: 8, 256>}]} {
    %c0 = arith.constant 0 : index
    %c0_0 = arith.constant 0 : index
    %0 = vector.load %arg2[%c0, %c0_0] : memref<8x256xf32, #tpu.memory_space<vmem>>, vector<8x256xf32>
    %1 = vector.extract_strided_slice %0 {offsets = [0, 0], sizes = [4, 256], strides = [1, 1]} : vector<8x256xf32> to vector<4x256xf32>
    %cst = arith.constant dense<0.000000e+00> : vector<256xf32>
    %2 = vector.multi_reduction <add>, %1, %cst [0] : vector<4x256xf32> to vector<256xf32>
    %3 = vector.shape_cast %2 : vector<256xf32> to vector<1x256xf32>
    %cst_1 = arith.constant 4.000000e+00 : f32
    %4 = vector.broadcast %cst_1 : f32 to vector<1x256xf32>
    %5 = arith.divf %3, %4 : vector<1x256xf32>
    %6 = vector.broadcast %5 : vector<1x256xf32> to vector<4x256xf32>
    %7 = arith.subf %1, %6 : vector<4x256xf32>
    %8 = arith.mulf %7, %7 : vector<4x256xf32>
    %cst_2 = arith.constant dense<0.000000e+00> : vector<256xf32>
    %9 = vector.multi_reduction <add>, %8, %cst_2 [0] : vector<4x256xf32> to vector<256xf32>
    %10 = vector.shape_cast %9 : vector<256xf32> to vector<1x256xf32>
    %cst_3 = arith.constant 4.000000e+00 : f32
    %11 = vector.broadcast %cst_3 : f32 to vector<1x256xf32>
    %12 = arith.divf %10, %11 : vector<1x256xf32>
    %cst_4 = arith.constant 9.99999974E-6 : f32
    %13 = vector.broadcast %cst_4 : f32 to vector<1x256xf32>
    %14 = arith.addf %12, %13 : vector<1x256xf32>
    %15 = math.rsqrt %14 : vector<1x256xf32>
    %16 = vector.broadcast %15 : vector<1x256xf32> to vector<4x256xf32>
    %17 = arith.mulf %7, %16 : vector<4x256xf32>
    %18 = vector.extract_strided_slice %0 {offsets = [4, 0], sizes = [4, 256], strides = [1, 1]} : vector<8x256xf32> to vector<4x256xf32>
    %cst_5 = arith.constant dense<0.000000e+00> : vector<256xf32>
    %19 = vector.multi_reduction <add>, %18, %cst_5 [0] : vector<4x256xf32> to vector<256xf32>
    %20 = vector.shape_cast %19 : vector<256xf32> to vector<1x256xf32>
    %cst_6 = arith.constant 4.000000e+00 : f32
    %21 = vector.broadcast %cst_6 : f32 to vector<1x256xf32>
    %22 = arith.divf %20, %21 : vector<1x256xf32>
    %23 = vector.broadcast %22 : vector<1x256xf32> to vector<4x256xf32>
    %24 = arith.subf %18, %23 : vector<4x256xf32>
    %25 = arith.mulf %24, %24 : vector<4x256xf32>
    %cst_7 = arith.constant dense<0.000000e+00> : vector<256xf32>
    %26 = vector.multi_reduction <add>, %25, %cst_7 [0] : vector<4x256xf32> to vector<256xf32>
    %27 = vector.shape_cast %26 : vector<256xf32> to vector<1x256xf32>
    %cst_8 = arith.constant 4.000000e+00 : f32
    %28 = vector.broadcast %cst_8 : f32 to vector<1x256xf32>
    %29 = arith.divf %27, %28 : vector<1x256xf32>
    %cst_9 = arith.constant 9.99999974E-6 : f32
    %30 = vector.broadcast %cst_9 : f32 to vector<1x256xf32>
    %31 = arith.addf %29, %30 : vector<1x256xf32>
    %32 = math.rsqrt %31 : vector<1x256xf32>
    %33 = vector.broadcast %32 : vector<1x256xf32> to vector<4x256xf32>
    %34 = arith.mulf %24, %33 : vector<4x256xf32>
    %35 = tpu.concatenate %17, %34 in 0 : vector<4x256xf32>, vector<4x256xf32> -> vector<8x256xf32>
    %c0_10 = arith.constant 0 : index
    %c0_11 = arith.constant 0 : index
    %36 = vector.load %arg3[%c0_10, %c0_11] : memref<8x1xf32, #tpu.memory_space<vmem>>, vector<8x1xf32>
    %37 = vector.broadcast %36 : vector<8x1xf32> to vector<8x256xf32>
    %38 = arith.mulf %35, %37 : vector<8x256xf32>
    %c0_12 = arith.constant 0 : index
    %c0_13 = arith.constant 0 : index
    %39 = vector.load %arg4[%c0_12, %c0_13] : memref<8x1xf32, #tpu.memory_space<vmem>>, vector<8x1xf32>
    %40 = vector.broadcast %39 : vector<8x1xf32> to vector<8x256xf32>
    %41 = arith.addf %38, %40 : vector<8x256xf32>
    %c0_14 = arith.constant 0 : index
    %c0_15 = arith.constant 0 : index
    %42 = vector.load %arg5[%c0_14, %c0_15] : memref<8x256xf32, #tpu.memory_space<vmem>>, vector<8x256xf32>
    tpu.vector_store %arg5[%c0_14, %c0_15], %41 {strides = array<i32>} : memref<8x256xf32, #tpu.memory_space<vmem>>, vector<8x256xf32>,
    return
  }
  func.func @transform_0(%arg0: i32, %arg1: i32) -> (i32, i32) {
    %c0_i32 = arith.constant 0 : i32
    return %arg0, %arg1 : i32, i32
  }
  func.func @transform_1(%arg0: i32, %arg1: i32) -> (i32, i32) {
    %c0_i32 = arith.constant 0 : i32
    %c0_i32_0 = arith.constant 0 : i32
    %c0_i32_1 = arith.constant 0 : i32
    return %c0_i32, %c0_i32_0 : i32, i32
  }
  func.func @transform_2(%arg0: i32, %arg1: i32) -> (i32, i32) {
    %c0_i32 = arith.constant 0 : i32
    %c0_i32_0 = arith.constant 0 : i32
    %c0_i32_1 = arith.constant 0 : i32
    return %c0_i32, %c0_i32_0 : i32, i32
  }
  func.func @transform_3(%arg0: i32, %arg1: i32) -> (i32, i32) {
    %c0_i32 = arith.constant 0 : i32
    return %arg0, %arg1 : i32, i32
  }
}

</mosaic_0001>

<bundles_post_ra>
// kernel: tpu_custom_call.1
= control target key start
LH: loop header
LB: loop body
LE: loop exit
PB: predicated region body
PF: predicated region fallthrough
CT: control target
= control target key end

     0   :  { %v184_v1 = vmov 0   ;;  %s240_s0 = inlined_call_operand.vmem [shape: f32[8,256], index: 0, kind: input, shape index: {}]   ;;  %s241_s1 = inlined_call_operand.vmem [shape: f32[8,1], index: 1, kind: input, shape index: {}]   ;;  %s242_s2 = inlined_call_operand.vmem [shape: f32[8,1], index: 2, kind: input, shape index: {}]   ;;  %s243_s3 = inlined_call_operand.hbm [shape: f32[8,256], index: 3, kind: output, shape index: {}]  }
   0x1   :  { %v117_v0 = vld [vmem:[%s241_s1] sm:$0xff]  ;;  %151 = vset.pattern.permute.xlu0 %v184_v1 }
   0x2   :  { %8 = vsyncpa [#allocation3], 0  ;;  %120 = vperm.xlu0 %151, %v117_v0   ;;  %v125_v2 = vld [vmem:[%s242_s2] sm:$0xff]  ;;  %v16_v4 = vld [vmem:[%s240_s0 + $0x8] sm:$0xff]  ;;  %vm17_vm0 = vcmask 1043456  }
   0x3   :  { %v15_v3 = vld [vmem:[%s240_s0] sm:$0xff]  ;;  %v64_v6 = vrot.slane %v16_v4, 4  ;;  %v25_v10 = vsel %vm17_vm0, %v16_v4, 0.0  ;;  %s185_s0 = smov [#allocation2]  }
   0x4   :  { %v63_v5 = vrot.slane %v15_v3, 4  ;;  %v18_v9 = vsel %vm17_vm0, %v15_v3, 0.0  ;;  %v26_v14 = vrot.slane %v25_v10, 4  ;;  %s141_s1 = sshll.u32 %s185_s0, 4  ;;  %s142_s1 = int_to_ptr.vmem [resolvable:$true] %s141_s1 }
   0x5   :  { %v74_v8 = vsel %vm17_vm0, %v64_v6, 0.0  ;;  %v19_v13 = vrot.slane %v18_v9, 4  ;;  %s160_s2 = scalar_lea.vmem %s142_s1, 256  ;;  %p165_p1 = scmp.lt.s32.totalorder %s142_s1, %s142_s1 }
   0x6   :  { %128 = vperm.xlu0 %151, %v125_v2   ;;  %v67_v7 = vsel %vm17_vm0, %v63_v5, 0.0  ;;  %v75_v12 = vrot.slane %v74_v8, 4  ;;  %v27_v18 = vadd.f32 %v26_v14, %v25_v10  ;;  %p161_p0 = scmp.ne.s32.totalorder %s142_s1, %s160_s2  ;;  %p166_p2 = scmp.lt.s32.totalorder %s160_s2, %s160_s2 }
   0x7   :  { %v68_v11 = vrot.slane %v67_v7, 4  ;;  %v20_v17 = vadd.f32 %v19_v13, %v18_v9 }
   0x8   :  { %v76_v16 = vadd.f32 %v75_v12, %v74_v8  ;;  %v28_v22 = vrot.slane %v27_v18, 2  ;;  %p167_p3 = por %p166_p2, %p165_p1 }
   0x9   :  { %v69_v15 = vadd.f32 %v68_v11, %v67_v7  ;;  %v21_v21 = vrot.slane %v20_v17, 2 }
   0xa   :  { %v77_v20 = vrot.slane %v76_v16, 2  ;;  %v29_v26 = vadd.f32 %v28_v22, %v27_v18  ;;  %p168_p4 = pnand %p167_p3, %p161_p0 }
   0xb   :  { %v70_v19 = vrot.slane %v69_v15, 2  ;;  %v22_v25 = vadd.f32 %v21_v21, %v20_v17 }
   0xc   :  { %v78_v24 = vadd.f32 %v77_v20, %v76_v16  ;;  %v30_v30 = vrot.slane %v29_v26, 1 }
   0xd   :  { %v71_v23 = vadd.f32 %v70_v19, %v69_v15  ;;  %v23_v29 = vrot.slane %v22_v25, 1 }
   0xe   :  { %v79_v28 = vrot.slane %v78_v24, 1  ;;  %v31_v34 = vadd.f32 %v30_v30, %v29_v26 }
   0xf   :  { %v72_v27 = vrot.slane %v71_v23, 1  ;;  %v24_v33 = vadd.f32 %v23_v29, %v22_v25 }
  0x10   :  { %v80_v32 = vadd.f32 %v79_v28, %v78_v24  ;;  %v34_v38 = vmul.f32 0.25, %v31_v34 }
  0x11   :  { %v73_v31 = vadd.f32 %v72_v27, %v71_v23  ;;  %v33_v37 = vmul.f32 0.25, %v24_v33 }
  0x12   :  { %v82_v36 = vmul.f32 0.25, %v80_v32  ;;  %v36_v42 = vsub.f32 %v16_v4, %v34_v38 }
  0x13   :  { %v81_v35 = vmul.f32 0.25, %v73_v31  ;;  %v35_v41 = vsub.f32 %v15_v3, %v33_v37 }
  0x14   :  { %v84_v40 = vsub.f32 %v16_v4, %v82_v36  ;;  %v38_v46 = vmul.f32 %v36_v42, %v36_v42 }
  0x15   :  { %v83_v39 = vsub.f32 %v15_v3, %v81_v35  ;;  %v37_v45 = vmul.f32 %v35_v41, %v35_v41 }
  0x16   :  { %v86_v44 = vmul.f32 %v84_v40, %v84_v40  ;;  %v46_v50 = vsel %vm17_vm0, %v38_v46, 0.0 }
  0x17   :  { %v85_v43 = vmul.f32 %v83_v39, %v83_v39  ;;  %v39_v49 = vsel %vm17_vm0, %v37_v45, 0.0  ;;  %v47_v54 = vrot.slane %v46_v50, 4 }
  0x18   :  { %v90_v48 = vrot.slane %v86_v44, 4  ;;  %v40_v52 = vrot.slane %v39_v49, 4 }
  0x19   :  { %v89_v47 = vrot.slane %v85_v43, 4  ;;  %v48_v58 = vadd.f32 %v47_v54, %v46_v50 }
  0x1a   :  { %v100_v53 = vsel %vm17_vm0, %v90_v48, 0.0  ;;  %v41_v57 = vadd.f32 %v40_v52, %v39_v49 }
  0x1b   :  { %v93_v51 = vsel %vm17_vm0, %v89_v47, 0.0  ;;  %v101_v56 = vrot.slane %v100_v53, 4  ;;  %v49_v62 = vrot.slane %v48_v58, 2 }
  0x1c   :  { %v94_v55 = vrot.slane %v93_v51, 4  ;;  %v42_v61 = vrot.slane %v41_v57, 2 }
  0x1d   :  { %v102_v60 = vadd.f32 %v101_v56, %v100_v53  ;;  %v50_v2 = vadd.f32 %v49_v62, %v48_v58 }
  0x1e   :  { %v95_v59 = vadd.f32 %v94_v55, %v93_v51  ;;  %v43_v1 = vadd.f32 %v42_v61, %v41_v57 }
  0x1f   :  { %v103_v0 = vrot.slane %v102_v60, 2  ;;  %v51_v6 = vrot.slane %v50_v2, 1 }
  0x20   :  { %v96_v63 = vrot.slane %v95_v59, 2  ;;  %v44_v5 = vrot.slane %v43_v1, 1 }
  0x21   :  { %v104_v4 = vadd.f32 %v103_v0, %v102_v60  ;;  %v52_v10 = vadd.f32 %v51_v6, %v50_v2 }
  0x22   :  { %v97_v3 = vadd.f32 %v96_v63, %v95_v59  ;;  %v45_v9 = vadd.f32 %v44_v5, %v43_v1 }
  0x23   :  { %v105_v8 = vrot.slane %v104_v4, 1  ;;  %v54_v14 = vmul.f32 0.25, %v52_v10 }
  0x24   :  { %v98_v7 = vrot.slane %v97_v3, 1  ;;  %v53_v13 = vmul.f32 0.25, %v45_v9 }
  0x25   :  { %v106_v12 = vadd.f32 %v105_v8, %v104_v4  ;;  %v56_v18 = vadd.f32 1e-05, %v54_v14 }
  0x26   :  { %v99_v11 = vadd.f32 %v98_v7, %v97_v3  ;;  %v55_v17 = vadd.f32 1e-05, %v53_v13 }
  0x27   :  { %v108_v16 = vmul.f32 0.25, %v106_v12 }
  0x28   :  { %v107_v15 = vmul.f32 0.25, %v99_v11  ;;  %152 = vrsqrt.f32 %v55_v17 }
  0x29   :  { %v110_v20 = vadd.f32 1e-05, %v108_v16  ;;  %154 = vrsqrt.f32 %v56_v18 }
  0x2a   :  { %v109_v19 = vadd.f32 1e-05, %v107_v15 }
  0x2c   :  { %156 = vrsqrt.f32 %v109_v19 }
  0x2d   :  { %158 = vrsqrt.f32 %v110_v20 }
  0x32   :  { %v153_v21 = vpop.eup %152 }
  0x33   :  { %v155_v22 = vpop.eup %154  ;;  %v59_v25 = vmul.f32 %v153_v21, %v35_v41 }
  0x34   :  { %v60_v26 = vmul.f32 %v155_v22, %v36_v42 }
  0x36   :  { %v157_v23 = vpop.eup %156 }
  0x37   :  { %v159_v24 = vpop.eup %158  ;;  %v113_v27 = vmul.f32 %v157_v23, %v83_v39 }
  0x38   :  { %v114_v28 = vmul.f32 %v159_v24, %v84_v40 }
  0x39   :  { %v115_v30 = vsel %vm17_vm0, %v59_v25, %v113_v27 }
  0x3a   :  { %v116_v31 = vsel %vm17_vm0, %v60_v26, %v114_v28 }
  0x81   :  { %v121_v29 = vpop.permute.xlu0 %120 }
  0x82   :  { %v123_v32 = vmul.f32 %v121_v29, %v115_v30  ;;  %v124_v33 = vmul.f32 %v121_v29, %v116_v31 }
  0x85   :  { %v129_v34 = vpop.permute.xlu0 %128 }
  0x86   :  { %v131_v35 = vadd.f32 %v129_v34, %v123_v32  ;;  %v132_v36 = vadd.f32 %v129_v34, %v124_v33 }
  0x88   :  { %133 = vst [vmem:[#allocation2] sm:$0xff] %v131_v35  ;;  %134 = vst [vmem:[#allocation2 + $0x8] sm:$0xff] %v132_v36 }
  0x89   :  { %171 = shalt.err (!%p168_p4)
}
  0x8a   :  { %s172_s22 = scalar_lea.hbm %s243_s3, 256 }
  0x8b   :  { %p173_p5 = scmp.ne.s32.totalorder %s243_s3, %s172_s22  ;;  %p176_p6 = scmp.lt.u32.totalorder %s172_s22, %s243_s3 }
  0x8d   :  { %p178_p7 = pnand %p176_p6, %p173_p5 }
  0x8f   :  { %181 = shalt.err (!%p178_p7)
}
  0x90   :  { %144 = dma.vmem_to_hbm [thread:$0]  %s142_s1, 256, %s243_s3, [#allocation3]  }
  0x91   :  { %182 = dma.done.wait [#allocation3], 256  }
  0x92   :  { %183 = vsyncadd [#allocation3], 4294967040 }
  0x93   :  { %148 = vsyncpa [#allocation3], 1 }

</bundles_post_ra>
